<compile_context>
chip_gen: v7x
topology: tpu7x:2x2x1
jax: 0.10.0
libtpu: 0.0.40
codegen_flags: <defaults>
</compile_context>

<pallas_src>
import jax
import jax.numpy as jnp
import numpy as np
from jax.experimental import pallas as pl
from jax.experimental.pallas import tpu as pltpu


def _make_encoder_kernel(T, B, H, E):
    """Whole-sequence kernel: no grid, everything resident in VMEM."""

    def kernel(x_ref, w1x_ref, b1_ref, wf_ref, b2_ref, out_ref):
        # x_ref  : (B, T, F)    batch-first input (as handed in by the caller)
        # w1x_ref: (F, H)       W1_ih^T
        # b1_ref : (1, H)       b1_ih + b1_hh
        # wf_ref : (H+E, H+E)   [[W1_hh^T, W2_ih^T], [0, W2_hh^T]]
        # b2_ref : (1, E)       b2_ih + b2_hh
        # out_ref: (B, T*E)     batch-first, lane-dense output (h2_t at lanes t*E:(t+1)*E)
        F = x_ref.shape[-1]

        # ---------- prologue: loop-invariant work, off the serial chain ----------
        # Hoisted input projection: one MXU pass for all time steps.
        x2d = x_ref[...].reshape(B * T, F)                       # layout no-op
        proj = (jnp.dot(x2d, w1x_ref[...],
                        preferred_element_type=jnp.float32)
                + b1_ref[...]).reshape(B, T, H)                  # (B, T, H)

        wf = wf_ref[...]                                         # (H+E, H+E)
        b2b = jnp.broadcast_to(b2_ref[...], (B, E))              # broadcast hoisted once
        zeros_h = jnp.zeros((B, H), jnp.float32)

        # Per-step additive rows [proj_{t+1} | b2]; last step's h1-half is unused.
        adds = [jnp.concatenate(
                    [proj[:, t + 1, :] if t + 1 < T else zeros_h, b2b], axis=-1)
                for t in range(T)]                               # each (B, H+E)

        # Peeled step 0: h1_0 = tanh(proj_0), h2_{-1} = 0 (no matmul needed).
        s = jnp.concatenate([jnp.tanh(proj[:, 0, :]),
                             jnp.zeros((B, E), jnp.float32)], axis=-1)   # (B, H+E)

        # ---------- serial recurrence: exactly ONE fused matmul per step ----------
        # s = [h1_t | h2_{t-1}];  s @ W_fused = [h1_t@W1hh^T | h1_t@W2ih^T + h2_{t-1}@W2hh^T]
        for t in range(T):
            s = jnp.tanh(jnp.dot(s, wf, preferred_element_type=jnp.float32)
                         + adds[t])                              # -> [h1_{t+1} | h2_t]
            out_ref[:, t * E:(t + 1) * E] = s[:, H:]             # h2_t (off the serial path)

    return kernel


@jax.jit
def encoder_forward(x, params):
    """x: (B, T, feat_dim) float32 -> (B, T, embed_dim) float32."""
    B, T, F = x.shape
    w1x, b1, wf, b2 = params
    H = w1x.shape[1]
    E = wf.shape[1] - H

    vmem = pl.BlockSpec(memory_space=pltpu.MemorySpace.VMEM)
    out = pl.pallas_call(
        _make_encoder_kernel(T, B, H, E),
        out_shape=jax.ShapeDtypeStruct((B, T * E), jnp.float32),
        in_specs=[vmem] * 5,
        out_specs=vmem,
    )(x, w1x, b1, wf, b2)
    # (B, T*E) -> (B, T, E) is a pure row-major reshape (free; no transpose HLO).
    return out.reshape(B, T, E)


def init_params(key, feat_dim, embed_dim):
    """Deterministic init mimicking nn.RNN's U(-1/sqrt(H), 1/sqrt(H))."""
    hidden_dim = 2 * embed_dim
    ks = jax.random.split(key, 8)

    def u(k, shape, bound):
        return jax.random.uniform(k, shape, jnp.float32, -bound, bound)

    s1 = 1.0 / np.sqrt(hidden_dim)
    s2 = 1.0 / np.sqrt(embed_dim)
    # PyTorch stores W_ih: (H, F), W_hh: (H, H); we pass transposed for x @ W.
    w1_ih = u(ks[0], (hidden_dim, feat_dim), s1)
    w1_hh = u(ks[1], (hidden_dim, hidden_dim), s1)
    b1_ih = u(ks[2], (hidden_dim,), s1)
    b1_hh = u(ks[3], (hidden_dim,), s1)
    w2_ih = u(ks[4], (embed_dim, hidden_dim), s2)
    w2_hh = u(ks[5], (embed_dim, embed_dim), s2)
    b2_ih = u(ks[6], (embed_dim,), s2)
    b2_hh = u(ks[7], (embed_dim,), s2)

    # Fused block weight: s @ W_fused with s = [h1 | h2_prev] yields
    #   [h1 @ W1_hh^T | h1 @ W2_ih^T + h2_prev @ W2_hh^T].
    w_fused = jnp.concatenate(
        [jnp.concatenate([w1_hh.T, w2_ih.T], axis=1),                       # (H, H+E)
         jnp.concatenate([jnp.zeros((embed_dim, hidden_dim), jnp.float32),
                          w2_hh.T], axis=1)],                               # (E, H+E)
        axis=0)                                                             # (H+E, H+E)

    return (
        w1_ih.T,                                       # (F, H)
        (b1_ih + b1_hh).reshape(1, hidden_dim),        # (1, H)
        w_fused,                                       # (H+E, H+E)
        (b2_ih + b2_hh).reshape(1, embed_dim),         # (1, E)
    )


def encoder_reference(x, params):
    """Pure-JAX reference (lax.scan) of the same two-layer RNN stack."""
    w1x, b1, wf, b2 = params
    H = w1x.shape[1]
    w1h = wf[:H, :H]      # W1_hh^T
    w2x = wf[:H, H:]      # W2_ih^T
    w2h = wf[H:, H:]      # W2_hh^T
    E = w2h.shape[0]
    B = x.shape[0]
    x_tm = jnp.transpose(x, (1, 0, 2))

    def step(carry, xt):
        h1, h2 = carry
        h1 = jnp.tanh(xt @ w1x + h1 @ w1h + b1)
        h2 = jnp.tanh(h1 @ w2x + h2 @ w2h + b2)
        return (h1, h2), h2

    init = (jnp.zeros((B, H), jnp.float32), jnp.zeros((B, E), jnp.float32))
    _, out_tm = jax.lax.scan(step, init, x_tm)
    return jnp.transpose(out_tm, (1, 0, 2))


if __name__ == "__main__":
    # Small shapes consistent with Encoder(seq_len, feat_dim, embed_dim=32)
    B, seq_len, feat_dim, embed_dim = 2, 8, 4, 32

    key = jax.random.PRNGKey(0)
    k_x, k_p = jax.random.split(key)
    x = jax.random.normal(k_x, (B, seq_len, feat_dim), jnp.float32)
    params = init_params(k_p, feat_dim, embed_dim)

    out = jax.block_until_ready(encoder_forward(x, params))
    ref = jax.block_until_ready(encoder_reference(x, params))

    assert out.shape == (B, seq_len, embed_dim)
    np.testing.assert_allclose(np.asarray(out), np.asarray(ref), atol=2e-5, rtol=2e-5)
    print("KERNEL_OK")
</pallas_src>

<mosaic_0001>
module attributes {stable_mosaic.version = 11 : i64} {
  func.func @kernel(%arg0: memref<2x8x4xf32, #tpu.memory_space<vmem>>, %arg1: memref<4x64xf32, #tpu.memory_space<vmem>>, %arg2: memref<1x64xf32, #tpu.memory_space<vmem>>, %arg3: memref<96x96xf32, #tpu.memory_space<vmem>>, %arg4: memref<1x32xf32, #tpu.memory_space<vmem>>, %arg5: memref<2x256xf32, #tpu.memory_space<vmem>>) attributes {dimension_semantics = [], scalar_prefetch = 0 : i64, scratch_operands = 0 : i64, tpu.core_type = #tpu.core_type<tc>} {
    %c0 = arith.constant 0 : index
    %c0_0 = arith.constant 0 : index
    %c0_1 = arith.constant 0 : index
    %0 = vector.load %arg0[%c0, %c0_0, %c0_1] : memref<2x8x4xf32, #tpu.memory_space<vmem>>, vector<2x8x4xf32>
    %1 = vector.shape_cast %0 : vector<2x8x4xf32> to vector<16x4xf32>
    %c0_2 = arith.constant 0 : index
    %c0_3 = arith.constant 0 : index
    %2 = vector.load %arg1[%c0_2, %c0_3] : memref<4x64xf32, #tpu.memory_space<vmem>>, vector<4x64xf32>
    %cst = arith.constant dense<0.000000e+00> : vector<16x64xf32>
    %3 = tpu.matmul %1, %2, %cst {dimension_numbers = #tpu.dot_dimension_numbers<[1], [0], [0], [1], [0, 0, 1, 1], [], []>} : vector<16x4xf32>, vector<4x64xf32>, vector<16x64xf32> -> vector<16x64xf32>
    %c0_4 = arith.constant 0 : index
    %c0_5 = arith.constant 0 : index
    %4 = vector.load %arg2[%c0_4, %c0_5] : memref<1x64xf32, #tpu.memory_space<vmem>>, vector<1x64xf32>
    %5 = vector.broadcast %4 : vector<1x64xf32> to vector<16x64xf32>
    %6 = arith.addf %3, %5 : vector<16x64xf32>
    %7 = vector.shape_cast %6 : vector<16x64xf32> to vector<2x8x64xf32>
    %c0_6 = arith.constant 0 : index
    %c0_7 = arith.constant 0 : index
    %8 = vector.load %arg3[%c0_6, %c0_7] : memref<96x96xf32, #tpu.memory_space<vmem>>, vector<96x96xf32>
    %c0_8 = arith.constant 0 : index
    %c0_9 = arith.constant 0 : index
    %9 = vector.load %arg4[%c0_8, %c0_9] : memref<1x32xf32, #tpu.memory_space<vmem>>, vector<1x32xf32>
    %10 = vector.shape_cast %9 : vector<1x32xf32> to vector<1x32xf32>
    %11 = vector.broadcast %10 : vector<1x32xf32> to vector<2x32xf32>
    %cst_10 = arith.constant 0.000000e+00 : f32
    %12 = vector.broadcast %cst_10 : f32 to vector<2x64xf32>
    %13 = vector.extract_strided_slice %7 {offsets = [0, 1, 0], sizes = [2, 1, 64], strides = [1, 1, 1]} : vector<2x8x64xf32> to vector<2x1x64xf32>
    %14 = vector.shape_cast %13 : vector<2x1x64xf32> to vector<2x64xf32>
    %15 = tpu.concatenate %14, %11 in 1 : vector<2x64xf32>, vector<2x32xf32> -> vector<2x96xf32>
    %16 = vector.extract_strided_slice %7 {offsets = [0, 2, 0], sizes = [2, 1, 64], strides = [1, 1, 1]} : vector<2x8x64xf32> to vector<2x1x64xf32>
    %17 = vector.shape_cast %16 : vector<2x1x64xf32> to vector<2x64xf32>
    %18 = tpu.concatenate %17, %11 in 1 : vector<2x64xf32>, vector<2x32xf32> -> vector<2x96xf32>
    %19 = vector.extract_strided_slice %7 {offsets = [0, 3, 0], sizes = [2, 1, 64], strides = [1, 1, 1]} : vector<2x8x64xf32> to vector<2x1x64xf32>
    %20 = vector.shape_cast %19 : vector<2x1x64xf32> to vector<2x64xf32>
    %21 = tpu.concatenate %20, %11 in 1 : vector<2x64xf32>, vector<2x32xf32> -> vector<2x96xf32>
    %22 = vector.extract_strided_slice %7 {offsets = [0, 4, 0], sizes = [2, 1, 64], strides = [1, 1, 1]} : vector<2x8x64xf32> to vector<2x1x64xf32>
    %23 = vector.shape_cast %22 : vector<2x1x64xf32> to vector<2x64xf32>
    %24 = tpu.concatenate %23, %11 in 1 : vector<2x64xf32>, vector<2x32xf32> -> vector<2x96xf32>
    %25 = vector.extract_strided_slice %7 {offsets = [0, 5, 0], sizes = [2, 1, 64], strides = [1, 1, 1]} : vector<2x8x64xf32> to vector<2x1x64xf32>
    %26 = vector.shape_cast %25 : vector<2x1x64xf32> to vector<2x64xf32>
    %27 = tpu.concatenate %26, %11 in 1 : vector<2x64xf32>, vector<2x32xf32> -> vector<2x96xf32>
    %28 = vector.extract_strided_slice %7 {offsets = [0, 6, 0], sizes = [2, 1, 64], strides = [1, 1, 1]} : vector<2x8x64xf32> to vector<2x1x64xf32>
    %29 = vector.shape_cast %28 : vector<2x1x64xf32> to vector<2x64xf32>
    %30 = tpu.concatenate %29, %11 in 1 : vector<2x64xf32>, vector<2x32xf32> -> vector<2x96xf32>
    %31 = vector.extract_strided_slice %7 {offsets = [0, 7, 0], sizes = [2, 1, 64], strides = [1, 1, 1]} : vector<2x8x64xf32> to vector<2x1x64xf32>
    %32 = vector.shape_cast %31 : vector<2x1x64xf32> to vector<2x64xf32>
    %33 = tpu.concatenate %32, %11 in 1 : vector<2x64xf32>, vector<2x32xf32> -> vector<2x96xf32>
    %34 = tpu.concatenate %12, %11 in 1 : vector<2x64xf32>, vector<2x32xf32> -> vector<2x96xf32>
    %35 = vector.extract_strided_slice %7 {offsets = [0, 0, 0], sizes = [2, 1, 64], strides = [1, 1, 1]} : vector<2x8x64xf32> to vector<2x1x64xf32>
    %36 = vector.shape_cast %35 : vector<2x1x64xf32> to vector<2x64xf32>
    %37 = math.tanh %36 : vector<2x64xf32>
    %cst_11 = arith.constant 0.000000e+00 : f32
    %38 = vector.broadcast %cst_11 : f32 to vector<2x32xf32>
    %39 = tpu.concatenate %37, %38 in 1 : vector<2x64xf32>, vector<2x32xf32> -> vector<2x96xf32>
    %cst_12 = arith.constant dense<0.000000e+00> : vector<2x96xf32>
    %40 = tpu.matmul %39, %8, %cst_12 {dimension_numbers = #tpu.dot_dimension_numbers<[1], [0], [0], [1], [0, 0, 1, 1], [], []>} : vector<2x96xf32>, vector<96x96xf32>, vector<2x96xf32> -> vector<2x96xf32>
    %41 = arith.addf %40, %15 : vector<2x96xf32>
    %42 = math.tanh %41 : vector<2x96xf32>
    %43 = vector.extract_strided_slice %42 {offsets = [0, 64], sizes = [2, 32], strides = [1, 1]} : vector<2x96xf32> to vector<2x32xf32>
    %c0_13 = arith.constant 0 : index
    %c0_14 = arith.constant 0 : index
    %44 = vector.load %arg5[%c0_13, %c0_14] : memref<2x256xf32, #tpu.memory_space<vmem>>, vector<2x32xf32>
    tpu.vector_store %arg5[%c0_13, %c0_14], %43 {strides = array<i32>} : memref<2x256xf32, #tpu.memory_space<vmem>>, vector<2x32xf32>,
    %cst_15 = arith.constant dense<0.000000e+00> : vector<2x96xf32>
    %45 = tpu.matmul %42, %8, %cst_15 {dimension_numbers = #tpu.dot_dimension_numbers<[1], [0], [0], [1], [0, 0, 1, 1], [], []>} : vector<2x96xf32>, vector<96x96xf32>, vector<2x96xf32> -> vector<2x96xf32>
    %46 = arith.addf %45, %18 : vector<2x96xf32>
    %47 = math.tanh %46 : vector<2x96xf32>
    %48 = vector.extract_strided_slice %47 {offsets = [0, 64], sizes = [2, 32], strides = [1, 1]} : vector<2x96xf32> to vector<2x32xf32>
    %c0_16 = arith.constant 0 : index
    %c32 = arith.constant 32 : index
    %49 = vector.load %arg5[%c0_16, %c32] : memref<2x256xf32, #tpu.memory_space<vmem>>, vector<2x32xf32>
    tpu.vector_store %arg5[%c0_16, %c32], %48 {strides = array<i32>} : memref<2x256xf32, #tpu.memory_space<vmem>>, vector<2x32xf32>,
    %cst_17 = arith.constant dense<0.000000e+00> : vector<2x96xf32>
    %50 = tpu.matmul %47, %8, %cst_17 {dimension_numbers = #tpu.dot_dimension_numbers<[1], [0], [0], [1], [0, 0, 1, 1], [], []>} : vector<2x96xf32>, vector<96x96xf32>, vector<2x96xf32> -> vector<2x96xf32>
    %51 = arith.addf %50, %21 : vector<2x96xf32>
    %52 = math.tanh %51 : vector<2x96xf32>
    %53 = vector.extract_strided_slice %52 {offsets = [0, 64], sizes = [2, 32], strides = [1, 1]} : vector<2x96xf32> to vector<2x32xf32>
    %c0_18 = arith.constant 0 : index
    %c64 = arith.constant 64 : index
    %54 = vector.load %arg5[%c0_18, %c64] : memref<2x256xf32, #tpu.memory_space<vmem>>, vector<2x32xf32>
    tpu.vector_store %arg5[%c0_18, %c64], %53 {strides = array<i32>} : memref<2x256xf32, #tpu.memory_space<vmem>>, vector<2x32xf32>,
    %cst_19 = arith.constant dense<0.000000e+00> : vector<2x96xf32>
    %55 = tpu.matmul %52, %8, %cst_19 {dimension_numbers = #tpu.dot_dimension_numbers<[1], [0], [0], [1], [0, 0, 1, 1], [], []>} : vector<2x96xf32>, vector<96x96xf32>, vector<2x96xf32> -> vector<2x96xf32>
    %56 = arith.addf %55, %24 : vector<2x96xf32>
    %57 = math.tanh %56 : vector<2x96xf32>
    %58 = vector.extract_strided_slice %57 {offsets = [0, 64], sizes = [2, 32], strides = [1, 1]} : vector<2x96xf32> to vector<2x32xf32>
    %c0_20 = arith.constant 0 : index
    %c96 = arith.constant 96 : index
    %59 = vector.load %arg5[%c0_20, %c96] : memref<2x256xf32, #tpu.memory_space<vmem>>, vector<2x32xf32>
    tpu.vector_store %arg5[%c0_20, %c96], %58 {strides = array<i32>} : memref<2x256xf32, #tpu.memory_space<vmem>>, vector<2x32xf32>,
    %cst_21 = arith.constant dense<0.000000e+00> : vector<2x96xf32>
    %60 = tpu.matmul %57, %8, %cst_21 {dimension_numbers = #tpu.dot_dimension_numbers<[1], [0], [0], [1], [0, 0, 1, 1], [], []>} : vector<2x96xf32>, vector<96x96xf32>, vector<2x96xf32> -> vector<2x96xf32>
    %61 = arith.addf %60, %27 : vector<2x96xf32>
    %62 = math.tanh %61 : vector<2x96xf32>
    %63 = vector.extract_strided_slice %62 {offsets = [0, 64], sizes = [2, 32], strides = [1, 1]} : vector<2x96xf32> to vector<2x32xf32>
    %c0_22 = arith.constant 0 : index
    %c128 = arith.constant 128 : index
    %64 = vector.load %arg5[%c0_22, %c128] : memref<2x256xf32, #tpu.memory_space<vmem>>, vector<2x32xf32>
    tpu.vector_store %arg5[%c0_22, %c128], %63 {strides = array<i32>} : memref<2x256xf32, #tpu.memory_space<vmem>>, vector<2x32xf32>,
    %cst_23 = arith.constant dense<0.000000e+00> : vector<2x96xf32>
    %65 = tpu.matmul %62, %8, %cst_23 {dimension_numbers = #tpu.dot_dimension_numbers<[1], [0], [0], [1], [0, 0, 1, 1], [], []>} : vector<2x96xf32>, vector<96x96xf32>, vector<2x96xf32> -> vector<2x96xf32>
    %66 = arith.addf %65, %30 : vector<2x96xf32>
    %67 = math.tanh %66 : vector<2x96xf32>
    %68 = vector.extract_strided_slice %67 {offsets = [0, 64], sizes = [2, 32], strides = [1, 1]} : vector<2x96xf32> to vector<2x32xf32>
    %c0_24 = arith.constant 0 : index
    %c160 = arith.constant 160 : index
    %69 = vector.load %arg5[%c0_24, %c160] : memref<2x256xf32, #tpu.memory_space<vmem>>, vector<2x32xf32>
    tpu.vector_store %arg5[%c0_24, %c160], %68 {strides = array<i32>} : memref<2x256xf32, #tpu.memory_space<vmem>>, vector<2x32xf32>,
    %cst_25 = arith.constant dense<0.000000e+00> : vector<2x96xf32>
    %70 = tpu.matmul %67, %8, %cst_25 {dimension_numbers = #tpu.dot_dimension_numbers<[1], [0], [0], [1], [0, 0, 1, 1], [], []>} : vector<2x96xf32>, vector<96x96xf32>, vector<2x96xf32> -> vector<2x96xf32>
    %71 = arith.addf %70, %33 : vector<2x96xf32>
    %72 = math.tanh %71 : vector<2x96xf32>
    %73 = vector.extract_strided_slice %72 {offsets = [0, 64], sizes = [2, 32], strides = [1, 1]} : vector<2x96xf32> to vector<2x32xf32>
    %c0_26 = arith.constant 0 : index
    %c192 = arith.constant 192 : index
    %74 = vector.load %arg5[%c0_26, %c192] : memref<2x256xf32, #tpu.memory_space<vmem>>, vector<2x32xf32>
    tpu.vector_store %arg5[%c0_26, %c192], %73 {strides = array<i32>} : memref<2x256xf32, #tpu.memory_space<vmem>>, vector<2x32xf32>,
    %cst_27 = arith.constant dense<0.000000e+00> : vector<2x96xf32>
    %75 = tpu.matmul %72, %8, %cst_27 {dimension_numbers = #tpu.dot_dimension_numbers<[1], [0], [0], [1], [0, 0, 1, 1], [], []>} : vector<2x96xf32>, vector<96x96xf32>, vector<2x96xf32> -> vector<2x96xf32>
    %76 = arith.addf %75, %34 : vector<2x96xf32>
    %77 = math.tanh %76 : vector<2x96xf32>
    %78 = vector.extract_strided_slice %77 {offsets = [0, 64], sizes = [2, 32], strides = [1, 1]} : vector<2x96xf32> to vector<2x32xf32>
    %c0_28 = arith.constant 0 : index
    %c224 = arith.constant 224 : index
    %79 = vector.load %arg5[%c0_28, %c224] : memref<2x256xf32, #tpu.memory_space<vmem>>, vector<2x32xf32>
    tpu.vector_store %arg5[%c0_28, %c224], %78 {strides = array<i32>} : memref<2x256xf32, #tpu.memory_space<vmem>>, vector<2x32xf32>,
    return
  }
}

</mosaic_0001>

<bundles_post_ra>
// kernel: encoder_forward.1
= control target key start
LH: loop header
LB: loop body
LE: loop exit
PB: predicated region body
PF: predicated region fallthrough
CT: control target
= control target key end

     0   :  { %10 = vsyncpa [#allocation3], 0  ;;  %s1428_s18 = smov [#allocation2]   ;;  %s1713_s0 = inlined_call_operand.vmem [shape: f32[2,8,4], index: 0, kind: input, shape index: {}]   ;;  %s1714_s1 = inlined_call_operand.vmem [shape: f32[4,64], index: 1, kind: input, shape index: {}]   ;;  %s1715_s2 = inlined_call_operand.vmem [shape: f32[1,64], index: 2, kind: input, shape index: {}]   ;;  %s1716_s3 = inlined_call_operand.hbm [shape: f32[96,96], index: 3, kind: input, shape index: {}]   ;;  %s1717_s4 = inlined_call_operand.vmem [shape: f32[1,32], index: 4, kind: input, shape index: {}]   ;;  %s1718_s5 = inlined_call_operand.vmem [shape: f32[2,256], index: 5, kind: output, shape index: {}]  }
   0x1   :  { %s22_s19 = sshll.u32 %s1428_s18, 4  ;;  %s1404_s22 = scalar_lea.hbm %s1716_s3, 1536  ;;  %s23_s19 = int_to_ptr.vmem [resolvable:$true] %s22_s19 }
   0x2   :  { %p1405_p0 = scmp.ne.s32.totalorder %s1716_s3, %s1404_s22  ;;  %p1408_p1 = scmp.lt.u32.totalorder %s1404_s22, %s1716_s3 }
   0x4   :  { %p1410_p2 = pnand %p1408_p1, %p1405_p0 }
   0x6   :  { %1413 = shalt.err (!%p1410_p2)
}
   0x7   :  { %s1414_s27 = scalar_lea.vmem %s23_s19, 1536  ;;  %p1419_p4 = scmp.lt.s32.totalorder %s23_s19, %s23_s19 }
   0x8   :  { %p1415_p3 = scmp.ne.s32.totalorder %s23_s19, %s1414_s27  ;;  %p1420_p5 = scmp.lt.s32.totalorder %s1414_s27, %s1414_s27 }
   0xa   :  { %p1421_p6 = por %p1420_p5, %p1419_p4 }
   0xc   :  { %p1422_p7 = pnand %p1421_p6, %p1415_p3 }
   0xe   :  { %1425 = shalt.err (!%p1422_p7)
}
   0xf   :  { %s1429_s28 = smov 128   ;;  %s1430_s29 = smov 8  }
  0x10   :  { %28 = dma.hbm_to_vmem [thread:$0]  %s1716_s3, 1536, %s23_s19, [#allocation3], %s1429_s28, %s1429_s28, %s1430_s29  }
  0x11   :  { %1426 = dma.done.wait [#allocation3], 1536  }
  0x12   :  { %1427 = vsyncadd [#allocation3], 4294965760  ;;  %v1431_v0 = vmov 0.0|0.0   ;;  %vm51_vm0 = vcmask 1043456   ;;  %vm44_vm1 = vcmask 31744   ;;  %v34_v2 = vld [vmem:[%s1713_s0] sm:$0xff]  ;;  %v275_v54 = vlaneseq }
  0x13   :  { %1230 = vmatprep.subr.bf16.mxu1 %v1431_v0  ;;  %v36_v1 = vld [vmem:[%s1714_s1] sm:$0xf]  ;;  %v35_v3 = vld [vmem:[%s1713_s0 + $0x8] sm:$0xff]  ;;  %1011 = vmatprep.mubr.msk.f32.mxu0 %vm44_vm1, %v34_v2  ;;  %s1432_s14 = smov 64   ;;  %v132_v8 = vld [vmem:[#allocation2 + $0x10] sm:$0xff]  ;;  %vm1433_vm2 = vmmov 0  }
  0x14   :  { %1009 = vmatprep.subr.msk.mxu0 %vm51_vm0, %v36_v1  ;;  %v893_v4 = vld [vmem:[%s1717_s4] ss:$0 sm:$0xff]  ;;  %v131_v6 = vld [vmem:[#allocation2 + $0x8] sm:$0xff]  ;;  %v133_v9 = vld [vmem:[#allocation2 + $0x18] sm:$0xff]  ;;  %v1434_v23 = vmov 0.0   ;;  %vm157_vm3 = vcmask 523264  }
  0x15   :  { %v130_v5 = vld [vmem:[#allocation2] sm:$0xff]  ;;  %1010 = vmatpush3.msk.msra.mxu0 %vm51_vm0, %v36_v1  ;;  %154 = vrot.lane.b32.xlu0 %v893_v4, %s1432_s14  ;;  %v1498_v10 = vpack.c.bf16 %v133_v9, %v132_v8  ;;  %v135_v12 = vld [vmem:[#allocation2 + $0x28] sm:$0xff]  ;;  %v136_v14 = vld [vmem:[#allocation2 + $0x30] sm:$0xff]  ;;  %vm151_vm4 = vcmask 1042434   ;;  %vm159_vm5 = vcmask 1043459   ;;  %vm163_vm6 = vcmask 1044484  }
  0x16   :  { %v1494_v7 = vpack.c.bf16 %v131_v6, %v130_v5  ;;  %1012 = vmatmul.mubr.msk.f32.vlgmr.msra.gmra.mrb[0].mxu0 %vm44_vm1, %v35_v3  ;;  %1248 = vmatprep.subr.bf16.mxu0 %v1431_v0  ;;  %v134_v11 = vld [vmem:[#allocation2 + $0x20] sm:$0xff]  ;;  %v137_v15 = vld [vmem:[#allocation2 + $0x38] sm:$0xff]  ;;  %v139_v18 = vld [vmem:[#allocation2 + $0x48] sm:$0xff]  ;;  %vm167_vm7 = vcmask 1045509   ;;  %vm171_vm8 = vcmask 1046534   ;;  %vm175_vm9 = vcmask 1047559  }
  0x17   :  { %v1507_v13 = vpack.c.bf16 %v135_v12, %v134_v11  ;;  %v1513_v16 = vpack.c.bf16 %v137_v15, %v136_v14  ;;  %v138_v17 = vld [vmem:[#allocation2 + $0x40] sm:$0xff]  ;;  %v140_v20 = vld [vmem:[#allocation2 + $0x50] sm:$0xff]  ;;  %v141_v21 = vld [vmem:[#allocation2 + $0x58] sm:$0xff]  ;;  %1038 = vmatprep.mubr.msk.f32.mxu1 %vm1433_vm2, %v1434_v23  ;;  %1065 = vmatprep.mubr.msk.f32.mxu0 %vm1433_vm2, %v1434_v23  ;;  %vm719_vm10 = vcmask 1040384   ;;  %vm189_vm11 = vcmask 1041409   ;;  %s1436_s15 = smov 96  }
  0x18   :  { %1232 = vmatpush3.bf16.msra.mxu1 %v1494_v7  ;;  %1250 = vmatpush3.bf16.msra.mxu0 %v1494_v7  ;;  %v1519_v19 = vpack.c.bf16 %v139_v18, %v138_v17  ;;  %v1525_v22 = vpack.c.bf16 %v141_v21, %v140_v20  ;;  %v889_v24 = vld [vmem:[%s1715_s2] ss:$0 sm:$0xff]  ;;  %vm196_vm12 = vcmask 785408   ;;  %v1435_v52 = vmov 1983009808   ;;  %s1437_s20 = smov 32  }
  0x19   :  { %1233 = vmatprep.subr.bf16.mxu1 %v1431_v0  ;;  %1251 = vmatprep.subr.bf16.mxu0 %v1431_v0  ;;  %v273_v53 = vunpack.c.l.s4 %v1435_v52  ;;  %v276_v56 = vshrl.u32 %v275_v54, 7  ;;  %vm282_vm13 = vcmask 254976   ;;  %vm371_vm14 = vcmask 517376  }
  0x1a   :  { %vm449_vm15 = vcmask 779776   ;;  %vm539_vm0 = vcmask 1042176  }
  0x1b   :  { %v274_v55 = vunpack.c.0.s8 %v273_v53 }
  0x1c   :  { %1235 = vmatpush3.bf16.msra.mxu1 %v1498_v10  ;;  %1253 = vmatpush3.bf16.msra.mxu0 %v1498_v10 }
  0x1d   :  { %1236 = vmatprep.subr.bf16.mxu1 %v1431_v0  ;;  %1254 = vmatprep.subr.bf16.mxu0 %v1431_v0  ;;  %v1574_v57 = vsub.s32 %v274_v55, %v276_v56 }
  0x20   :  { %1238 = vmatpush3.bf16.msra.mxu1 %v1507_v13  ;;  %1256 = vmatpush3.bf16.msra.mxu0 %v1507_v13 }
  0x21   :  { %1239 = vmatprep.subr.bf16.mxu1 %v1431_v0  ;;  %1257 = vmatprep.subr.bf16.mxu0 %v1431_v0 }
  0x24   :  { %1241 = vmatpush3.bf16.msra.mxu1 %v1513_v16  ;;  %1259 = vmatpush3.bf16.msra.mxu0 %v1513_v16 }
  0x25   :  { %1242 = vmatprep.subr.bf16.mxu1 %v1431_v0  ;;  %1260 = vmatprep.subr.bf16.mxu0 %v1431_v0 }
  0x28   :  { %1244 = vmatpush3.bf16.msra.mxu1 %v1519_v19  ;;  %1262 = vmatpush3.bf16.msra.mxu0 %v1519_v19 }
  0x29   :  { %1245 = vmatprep.subr.bf16.mxu1 %v1431_v0  ;;  %1263 = vmatprep.subr.bf16.mxu0 %v1431_v0 }
  0x2c   :  { %1247 = vmatpush3.bf16.msra.mxu1 %v1525_v22  ;;  %1265 = vmatpush3.bf16.msra.mxu0 %v1525_v22 }
  0x2d   :  { %1266 = vmatprep.subr.bf16.mxu1 %v1431_v0  ;;  %1284 = vmatprep.subr.bf16.mxu0 %v1431_v0 }
  0x87   :  { %v1538_v28 = vpop.permute.xlu0 %154 }
  0xe9   :  { %v1013_v25 = vpop.f32.mrb[0].mxu0 }
  0xea   :  { %v127_v26 = vadd.f32 %v1013_v25, %v889_v24  ;;  %v121_v27 = vpop.f32.mrb[1].mxu0 }
  0xeb   :  { %v122_v29 = vadd.f32 %v889_v24, %v121_v27 }
  0xec   :  { %v150_v30 = vrot.slane %v127_v26, 7  ;;  %1384 = vtanh.f32 %v127_v26 }
  0xed   :  { %1386 = vtanh.f32 %v122_v29  ;;  %v181_v31 = vsel %vm157_vm3, %v122_v29, %v1538_v28 }
  0xee   :  { %v152_v32 = vsel %vm151_vm4, %v150_v30, %v122_v29  ;;  %v1542_v33 = vsel %vm159_vm5, %v150_v30, %v122_v29  ;;  %v1544_v34 = vsel %vm163_vm6, %v150_v30, %v122_v29  ;;  %v1546_v35 = vsel %vm167_vm7, %v150_v30, %v122_v29 }
  0xef   :  { %v1548_v36 = vsel %vm171_vm8, %v150_v30, %v122_v29  ;;  %v1550_v37 = vsel %vm175_vm9, %v150_v30, %v122_v29  ;;  %v182_v38 = vsel %vm157_vm3, %v150_v30, %v1538_v28  ;;  %v720_v39 = vrot.slane %v181_v31, 7 }
  0xf0   :  { %v721_v40 = vrot.slane %v182_v38, 7  ;;  %v158_v47 = vsel %vm157_vm3, %v152_v32, %v1538_v28  ;;  %v162_v61 = vsel %vm157_vm3, %v1542_v33, %v1538_v28  ;;  %v166_v6 = vsel %vm157_vm3, %v1544_v34, %v1538_v28 }
  0xf1   :  { %v194_v48 = vrot.slane %v158_v47, 1  ;;  %v285_v62 = vrot.slane %v162_v61, 2  ;;  %v374_v8 = vrot.slane %v166_v6, 3  ;;  %v170_v15 = vsel %vm157_vm3, %v1546_v35, %v1538_v28 }
  0xf2   :  { %v1554_v41 = vsel %vm719_vm10, %v720_v39, %v721_v40  ;;  %v452_v17 = vrot.slane %v170_v15, 4  ;;  %v174_v25 = vsel %vm157_vm3, %v1548_v36, %v1538_v28  ;;  %v183_v40 = vsel %vm157_vm3, 0.0, %v1538_v28 }
  0xf3   :  { %v542_v26 = vrot.slane %v174_v25, 5 }
  0xf6   :  { %v1385_v42 = vpop.eup %1384 }
  0xf7   :  { %v1387_v43 = vpop.eup %1386  ;;  %v188_v44 = vrot.slane %v1385_v42, 7 }
  0xf9   :  { %v190_v45 = vsel %vm189_vm11, %v188_v44, %v1387_v43 }
  0xfa   :  { %v192_v46 = vsel %vm157_vm3, %v190_v45, 0.0 }
  0xfb   :  { %1039 = vmatmul.mubr.msk.f32.vlgmr.msra.gmra.mrb[0].mxu1 %vm196_vm12, %v192_v46 }
  0xfc   :  { %1268 = vmatpush3.bf16.msra.mxu1 %v1494_v7  ;;  %1092 = vmatprep.mubr.msk.f32.mxu1 %vm1433_vm2, %v1434_v23 }
  0xfd   :  { %1269 = vmatprep.subr.bf16.mxu1 %v1431_v0 }
 0x100   :  { %1271 = vmatpush3.bf16.msra.mxu1 %v1498_v10 }
 0x101   :  { %1272 = vmatprep.subr.bf16.mxu1 %v1431_v0 }
 0x104   :  { %1274 = vmatpush3.bf16.msra.mxu1 %v1507_v13 }
 0x105   :  { %1275 = vmatprep.subr.bf16.mxu1 %v1431_v0 }
 0x108   :  { %1277 = vmatpush3.bf16.msra.mxu1 %v1513_v16 }
 0x109   :  { %1278 = vmatprep.subr.bf16.mxu1 %v1431_v0 }
 0x10c   :  { %1280 = vmatpush3.bf16.msra.mxu1 %v1519_v19 }
 0x10d   :  { %1281 = vmatprep.subr.bf16.mxu1 %v1431_v0 }
 0x110   :  { %1283 = vmatpush3.bf16.msra.mxu1 %v1525_v22 }
 0x111   :  { %1302 = vmatprep.subr.bf16.mxu1 %v1431_v0 }
 0x1ce   :  { %v266_v49 = vpop.f32.mrb[0].mxu1 }
 0x1cf   :  { %v267_v50 = vadd.f32 %v266_v49, %v194_v48  ;;  %v1040_v51 = vpop.f32.mrb[1].mxu1 }
 0x1d1   :  { %1388 = vtanh.f32 %v267_v50 }
 0x1db   :  { %v1389_v58 = vpop.eup %1388 }
 0x1dc   :  { %1066 = vmatmul.mubr.msk.f32.vlgmr.msra.gmra.mrb[2].mxu0 %vm196_vm12, %v1389_v58  ;;  %v278_v59 = vrot.slane %v1389_v58, %v1574_v57 }
 0x1dd   :  { %1286 = vmatpush3.bf16.msra.mxu0 %v1494_v7  ;;  %1119 = vmatprep.mubr.msk.f32.mxu0 %vm1433_vm2, %v1434_v23 }
 0x1de   :  { %279 = vrot.lane.b32.xlu0 %v278_v59, %s1432_s14  ;;  %1287 = vmatprep.subr.bf16.mxu0 %v1431_v0 }
 0x1e1   :  { %1289 = vmatpush3.bf16.msra.mxu0 %v1498_v10 }
 0x1e2   :  { %1290 = vmatprep.subr.bf16.mxu0 %v1431_v0 }
 0x1e5   :  { %1292 = vmatpush3.bf16.msra.mxu0 %v1507_v13 }
 0x1e6   :  { %1293 = vmatprep.subr.bf16.mxu0 %v1431_v0 }
 0x1e9   :  { %1295 = vmatpush3.bf16.msra.mxu0 %v1513_v16 }
 0x1ea   :  { %1296 = vmatprep.subr.bf16.mxu0 %v1431_v0 }
 0x1ed   :  { %1298 = vmatpush3.bf16.msra.mxu0 %v1519_v19 }
 0x1ee   :  { %1299 = vmatprep.subr.bf16.mxu0 %v1431_v0 }
 0x1f1   :  { %1301 = vmatpush3.bf16.msra.mxu0 %v1525_v22 }
 0x1f2   :  { %1320 = vmatprep.subr.bf16.mxu0 %v1431_v0 }
 0x250   :  { %v280_v60 = vpop.permute.xlu0 %279 }
 0x251   :  { %283 = vst.msk [vmem:[%s1718_s5] sm:$0x3] %vm282_vm13, %v280_v60 }
 0x2af   :  { %v355_v63 = vpop.f32.mrb[2].mxu0 }
 0x2b0   :  { %v356_v1 = vadd.f32 %v355_v63, %v285_v62  ;;  %v1067_v2 = vpop.f32.mrb[3].mxu0 }
 0x2b2   :  { %1390 = vtanh.f32 %v356_v1 }
 0x2bc   :  { %v1391_v3 = vpop.eup %1390 }
 0x2bd   :  { %1093 = vmatmul.mubr.msk.f32.vlgmr.msra.gmra.mrb[2].mxu1 %vm196_vm12, %v1391_v3  ;;  %v367_v4 = vrot.slane %v1391_v3, %v1574_v57 }
 0x2be   :  { %1304 = vmatpush3.bf16.msra.mxu1 %v1494_v7  ;;  %1146 = vmatprep.mubr.msk.f32.mxu1 %vm1433_vm2, %v1434_v23 }
 0x2bf   :  { %368 = vrot.lane.b32.xlu1 %v367_v4, %s1436_s15  ;;  %1305 = vmatprep.subr.bf16.mxu1 %v1431_v0 }
 0x2c2   :  { %1307 = vmatpush3.bf16.msra.mxu1 %v1498_v10 }
 0x2c3   :  { %1308 = vmatprep.subr.bf16.mxu1 %v1431_v0 }
 0x2c6   :  { %1310 = vmatpush3.bf16.msra.mxu1 %v1507_v13 }
 0x2c7   :  { %1311 = vmatprep.subr.bf16.mxu1 %v1431_v0 }
 0x2ca   :  { %1313 = vmatpush3.bf16.msra.mxu1 %v1513_v16 }
 0x2cb   :  { %1314 = vmatprep.subr.bf16.mxu1 %v1431_v0 }
 0x2ce   :  { %1316 = vmatpush3.bf16.msra.mxu1 %v1519_v19 }
 0x2cf   :  { %1317 = vmatprep.subr.bf16.mxu1 %v1431_v0 }
 0x2d2   :  { %1319 = vmatpush3.bf16.msra.mxu1 %v1525_v22 }
 0x2d3   :  { %1338 = vmatprep.subr.bf16.mxu1 %v1431_v0 }
 0x331   :  { %v369_v5 = vpop.permute.xlu1 %368 }
 0x332   :  { %372 = vst.msk [vmem:[%s1718_s5] sm:$0x3] %vm371_vm14, %v369_v5 }
 0x390   :  { %v444_v9 = vpop.f32.mrb[2].mxu1 }
 0x391   :  { %v445_v11 = vadd.f32 %v444_v9, %v374_v8  ;;  %v1094_v12 = vpop.f32.mrb[3].mxu1 }
 0x393   :  { %1392 = vtanh.f32 %v445_v11 }
 0x39d   :  { %v1393_v14 = vpop.eup %1392 }
 0x39e   :  { %1120 = vmatmul.mubr.msk.f32.vlgmr.msra.gmra.mrb[4].mxu0 %vm196_vm12, %v1393_v14  ;;  %450 = vst.msk [vmem:[%s1718_s5] sm:$0x3] %vm449_vm15, %v1393_v14 }
 0x39f   :  { %1322 = vmatpush3.bf16.msra.mxu0 %v1494_v7  ;;  %1173 = vmatprep.mubr.msk.f32.mxu0 %vm1433_vm2, %v1434_v23 }
 0x3a0   :  { %1323 = vmatprep.subr.bf16.mxu0 %v1431_v0 }
 0x3a3   :  { %1325 = vmatpush3.bf16.msra.mxu0 %v1498_v10 }
 0x3a4   :  { %1326 = vmatprep.subr.bf16.mxu0 %v1431_v0 }
 0x3a7   :  { %1328 = vmatpush3.bf16.msra.mxu0 %v1507_v13 }
 0x3a8   :  { %1329 = vmatprep.subr.bf16.mxu0 %v1431_v0 }
 0x3ab   :  { %1331 = vmatpush3.bf16.msra.mxu0 %v1513_v16 }
 0x3ac   :  { %1332 = vmatprep.subr.bf16.mxu0 %v1431_v0 }
 0x3af   :  { %1334 = vmatpush3.bf16.msra.mxu0 %v1519_v19 }
 0x3b0   :  { %1335 = vmatprep.subr.bf16.mxu0 %v1431_v0 }
 0x3b3   :  { %1337 = vmatpush3.bf16.msra.mxu0 %v1525_v22 }
 0x3b4   :  { %1356 = vmatprep.subr.bf16.mxu0 %v1431_v0 }
 0x471   :  { %v523_v18 = vpop.f32.mrb[4].mxu0 }
 0x472   :  { %v524_v20 = vadd.f32 %v523_v18, %v452_v17  ;;  %v1121_v21 = vpop.f32.mrb[5].mxu0 }
 0x474   :  { %1394 = vtanh.f32 %v524_v20 }
 0x47e   :  { %v1395_v24 = vpop.eup %1394 }
 0x47f   :  { %1147 = vmatmul.mubr.msk.f32.vlgmr.msra.gmra.mrb[4].mxu1 %vm196_vm12, %v1395_v24  ;;  %v535_v33 = vrot.slane %v1395_v24, %v1574_v57 }
 0x480   :  { %1340 = vmatpush3.bf16.msra.mxu1 %v1494_v7  ;;  %1200 = vmatprep.mubr.msk.f32.mxu1 %vm1433_vm2, %v1434_v23 }
 0x481   :  { %1341 = vmatprep.subr.bf16.mxu1 %v1431_v0 }
 0x484   :  { %1343 = vmatpush3.bf16.msra.mxu1 %v1498_v10 }
 0x485   :  { %1344 = vmatprep.subr.bf16.mxu1 %v1431_v0 }
 0x488   :  { %1346 = vmatpush3.bf16.msra.mxu1 %v1507_v13 }
 0x489   :  { %1347 = vmatprep.subr.bf16.mxu1 %v1431_v0 }
 0x48c   :  { %1349 = vmatpush3.bf16.msra.mxu1 %v1513_v16 }
 0x48d   :  { %1350 = vmatprep.subr.bf16.mxu1 %v1431_v0 }
 0x490   :  { %1352 = vmatpush3.bf16.msra.mxu1 %v1519_v19 }
 0x491   :  { %1353 = vmatprep.subr.bf16.mxu1 %v1431_v0 }
 0x494   :  { %1355 = vmatpush3.bf16.msra.mxu1 %v1525_v22 }
 0x552   :  { %v612_v27 = vpop.f32.mrb[4].mxu1 }
 0x553   :  { %v613_v29 = vadd.f32 %v612_v27, %v542_v26  ;;  %v1148_v30 = vpop.f32.mrb[5].mxu1 }
 0x555   :  { %1396 = vtanh.f32 %v613_v29 }
 0x55f   :  { %v1397_v31 = vpop.eup %1396 }
 0x560   :  { %1174 = vmatmul.mubr.msk.f32.vlgmr.msra.gmra.mrb[6].mxu0 %vm196_vm12, %v1397_v31  ;;  %v624_v32 = vrot.slane %v1397_v31, %v1574_v57 }
 0x561   :  { %1358 = vmatpush3.bf16.msra.mxu0 %v1494_v7  ;;  %1227 = vmatprep.mubr.msk.f32.mxu0 %vm1433_vm2, %v1434_v23 }
 0x562   :  { %625 = vrot.lane.b32.xlu1 %v624_v32, %s1432_s14  ;;  %1359 = vmatprep.subr.bf16.mxu0 %v1431_v0 }
 0x565   :  { %1361 = vmatpush3.bf16.msra.mxu0 %v1498_v10 }
 0x566   :  { %536 = vrot.lane.b32.xlu1 %v535_v33, %s1437_s20  ;;  %1362 = vmatprep.subr.bf16.mxu0 %v1431_v0 }
 0x569   :  { %1364 = vmatpush3.bf16.msra.mxu0 %v1507_v13  ;;  %v178_v13 = vsel %vm157_vm3, %v1550_v37, %v1538_v28 }
 0x56a   :  { %1365 = vmatprep.subr.bf16.mxu0 %v1431_v0 }
 0x56d   :  { %1367 = vmatpush3.bf16.msra.mxu0 %v1513_v16 }
 0x56e   :  { %1368 = vmatprep.subr.bf16.mxu0 %v1431_v0 }
 0x571   :  { %1370 = vmatpush3.bf16.msra.mxu0 %v1519_v19 }
 0x572   :  { %1371 = vmatprep.subr.bf16.mxu0 %v1431_v0  ;;  %v630_v0 = vrot.slane %v178_v13, 6 }
 0x575   :  { %1373 = vmatpush3.bf16.msra.mxu0 %v1525_v22 }
 0x5d4   :  { %v626_v7 = vpop.permute.xlu1 %625 }
 0x5d5   :  { %628 = vst.msk [vmem:[%s1718_s5 + $0x2] sm:$0x3] %vm282_vm13, %v626_v7 }
 0x5d8   :  { %v537_v10 = vpop.permute.xlu1 %536 }
 0x5d9   :  { %540 = vst.msk [vmem:[%s1718_s5] sm:$0x3] %vm539_vm0, %v537_v10 }
 0x633   :  { %v700_v16 = vpop.f32.mrb[6].mxu0 }
 0x634   :  { %v701_v19 = vadd.f32 %v700_v16, %v630_v0  ;;  %v1175_v22 = vpop.f32.mrb[7].mxu0 }
 0x636   :  { %1398 = vtanh.f32 %v701_v19 }
 0x640   :  { %v1399_v23 = vpop.eup %1398 }
 0x641   :  { %1201 = vmatmul.mubr.msk.f32.vlgmr.msra.gmra.mrb[6].mxu1 %vm196_vm12, %v1399_v23  ;;  %v712_v34 = vrot.slane %v1399_v23, %v1574_v57 }
 0x643   :  { %713 = vrot.lane.b32.xlu0 %v712_v34, %s1436_s15 }
 0x6b5   :  { %v714_v35 = vpop.permute.xlu0 %713 }
 0x6b6   :  { %716 = vst.msk [vmem:[%s1718_s5 + $0x2] sm:$0x3] %vm371_vm14, %v714_v35 }
 0x714   :  { %v792_v36 = vpop.f32.mrb[6].mxu1 }
 0x715   :  { %v793_v37 = vadd.f32 %v792_v36, %v1554_v41  ;;  %v1202_v38 = vpop.f32.mrb[7].mxu1 }
 0x717   :  { %1400 = vtanh.f32 %v793_v37 }
 0x721   :  { %v1401_v39 = vpop.eup %1400 }
 0x722   :  { %797 = vst.msk [vmem:[%s1718_s5 + $0x2] sm:$0x3] %vm449_vm15, %v1401_v39  ;;  %1228 = vmatmul.mubr.msk.f32.vlgmr.msra.gmra.mrb[8].mxu0 %vm196_vm12, %v1401_v39 }
 0x7f5   :  { %v867_v42 = vpop.f32.mrb[8].mxu0 }
 0x7f6   :  { %v868_v43 = vadd.f32 %v867_v42, %v183_v40  ;;  %v1229_v44 = vpop.f32.mrb[9].mxu0 }
 0x7f8   :  { %1402 = vtanh.f32 %v868_v43 }
 0x802   :  { %v1403_v45 = vpop.eup %1402 }
 0x803   :  { %v879_v41 = vrot.slane %v1403_v45, %v1574_v57 }
 0x805   :  { %880 = vrot.lane.b32.xlu0 %v879_v41, %s1437_s20 }
 0x877   :  { %v881_v46 = vpop.permute.xlu0 %880 }
 0x878   :  { %883 = vst.msk [vmem:[%s1718_s5 + $0x2] sm:$0x3] %vm539_vm0, %v881_v46 }
 0x879   :  { %888 = vsyncpa [#allocation3], 1 }

</bundles_post_ra>
